<compile_context>
chip_gen: v7x
topology: tpu7x:2x2x1
jax: 0.10.0
libtpu: 0.0.40
codegen_flags: <defaults>
</compile_context>

<pallas_src>
import jax
import jax.numpy as jnp
from jax import lax
from jax.experimental import pallas as pl
from jax.experimental.pallas import tpu as pltpu


def _round_up(n: int, m: int) -> int:
    return (n + m - 1) // m * m


def _cdiv(a: int, b: int) -> int:
    return -(-a // b)


def _tpu_generation() -> int:
    """Best-effort TPU generation from device_kind ('TPU v5 lite', 'TPU v6e',
    'TPU7x', ...). Returns 0 if unknown."""
    try:
        kind = jax.devices()[0].device_kind.lower()
    except Exception:
        return 0
    for g in (7, 6, 5, 4):
        if f"v{g}" in kind or f"tpu{g}" in kind:
            return g
    return 0


def _physical_vmem_bytes(gen: int) -> int:
    try:
        return int(pltpu.get_tpu_info().vmem_capacity_bytes)
    except Exception:
        if gen >= 7:
            return 64 << 20      # v7x: 64 MiB per TensorCore
        if gen in (4, 5, 6):
            return 128 << 20     # v4/v5e/v6e: 128 MiB
        return 64 << 20


def _pad_lane_dim(n: int, gen: int) -> int:
    """Pad to a multiple of 128; round to 256 on v6e/v7x only when cheap
    (<= 12.5% extra over the 128-padded size) to fill the 2x256 MXU."""
    p = _round_up(n, 128)
    if gen >= 6:
        p256 = _round_up(n, 256)
        if p256 - p <= p // 8:
            p = p256
    return p


def _make_kernel(n_chunks: int, chunk: int):
    """Build the fused-MLP kernel. n_chunks==1 -> single-shot; otherwise loop
    over `chunk`-wide slices of the fused hidden dim with an f32 accumulator."""
    if n_chunks == 1:
        def kernel(x_ref, w1_ref, b1_ref, w2_ref, b2_ref, o_ref):
            x = x_ref[...]
            h = jnp.dot(x, w1_ref[...], preferred_element_type=jnp.float32) + b1_ref[...]
            h = jnp.maximum(h, 0.0)
            y = jnp.dot(h.astype(w2_ref.dtype), w2_ref[...],
                        preferred_element_type=jnp.float32) + b2_ref[...]
            o_ref[...] = y.astype(o_ref.dtype)
        return kernel

    def kernel(x_ref, w1_ref, b1_ref, w2_ref, b2_ref, o_ref):
        x = x_ref[...]
        bt = x.shape[0]
        d_out = o_ref.shape[1]

        def body(j, acc):
            start = pl.multiple_of(j * chunk, 128)
            w1c = w1_ref[:, pl.ds(start, chunk)]
            b1c = b1_ref[:, pl.ds(start, chunk)]
            w2c = w2_ref[pl.ds(start, chunk), :]
            h = jnp.dot(x, w1c, preferred_element_type=jnp.float32) + b1c
            h = jnp.maximum(h, 0.0)
            return acc + jnp.dot(h.astype(w2c.dtype), w2c,
                                 preferred_element_type=jnp.float32)

        acc0 = jnp.zeros((bt, d_out), jnp.float32)
        acc = lax.fori_loop(0, n_chunks, body, acc0, unroll=(n_chunks <= 8))
        o_ref[...] = (acc + b2_ref[...]).astype(o_ref.dtype)
    return kernel


def ensemble_forward(x, params_a, params_b, alpha=0.5, *,
                     batch_tile: int = 1024,
                     compute_dtype=None,
                     out_dtype=None,
                     hidden_chunk: int = 1024,
                     vmem_budget_bytes=None):
    """Fused ensemble forward.

    x: [B, D_in]; params_*: dicts with PyTorch-convention weights
    w1:[H,D_in], b1:[H], w2:[D_out,H], b2:[D_out].

    compute_dtype: matmul-operand dtype. None -> auto (bfloat16 on TPU; MXU
      accumulation and biases/ReLU stay f32). Pass jnp.float32 for strict math.
    out_dtype: stored output dtype (default: x.dtype).
    hidden_chunk: column width (rounded to 128) for the in-kernel hidden-dim
      reduction when the fused hidden dim exceeds it.
    vmem_budget_bytes: VMEM planning budget. None -> per-generation default
      (v5e/v6e ~64 MiB, v7x ~48 MiB, unknown 32 MiB). Also used as the Mosaic
      scoped-VMEM limit (clamped to physical VMEM).
    """
    B, D_in = x.shape
    gen = _tpu_generation()
    phys_vmem = _physical_vmem_bytes(gen)

    out_dtype = jnp.dtype(out_dtype) if out_dtype is not None else jnp.dtype(x.dtype)
    if compute_dtype is not None:
        mm_dtype = jnp.dtype(compute_dtype)
    else:
        # bf16 operands are the MXU fast path on every TPU generation; biases
        # and ReLU stay f32 (v5e has no bf16 VPU).
        mm_dtype = jnp.dtype(jnp.bfloat16) if jax.default_backend() == "tpu" \
            else jnp.dtype(x.dtype)

    if vmem_budget_bytes is None:
        if gen >= 7:
            vmem_budget_bytes = 48 << 20     # leave headroom under 64 MiB/TC
        elif gen in (4, 5, 6):
            vmem_budget_bytes = 64 << 20
        else:
            vmem_budget_bytes = 32 << 20
    vmem_budget_bytes = int(min(vmem_budget_bytes, phys_vmem))

    # ---- fuse the two models + alpha into one wider MLP (plain-JAX glue) ----
    # TODO(synk): for serving with frequently-varying alpha, keep W2c unscaled
    # and apply (1-a)/a to the two halves of relu(h) inside the kernel instead.
    w1a, b1a, w2a, b2a = params_a["w1"], params_a["b1"], params_a["w2"], params_a["b2"]
    w1b, b1b, w2b, b2b = params_b["w1"], params_b["b1"], params_b["w2"], params_b["b2"]
    D_out = w2a.shape[0]

    a = jnp.float32(alpha)
    w1c = jnp.concatenate([w1a.T, w1b.T], axis=1)                      # [D_in, 2H]
    b1c = jnp.concatenate([b1a, b1b], axis=0)                          # [2H]
    w2c = jnp.concatenate([(1.0 - a) * w2a.T, a * w2b.T], axis=0)      # [2H, D_out]
    b2c = (1.0 - a) * b2a + a * b2b                                    # [D_out]

    # ---- lane padding (zero pad) ----
    H2 = w1c.shape[1]
    H2p = _pad_lane_dim(H2, gen)
    D_out_p = _pad_lane_dim(D_out, gen)

    # Hidden-dim chunking decision (caps activation VMEM at bt x chunk).
    hidden_chunk = max(128, _round_up(int(hidden_chunk), 128))
    if H2p > hidden_chunk:
        H2p = _round_up(H2p, hidden_chunk)
        chunk = hidden_chunk
        n_chunks = H2p // hidden_chunk
    else:
        chunk = H2p
        n_chunks = 1

    # Pad D_in only when relative padding is small (unmasked x loads, clean K).
    D_in_p = D_in
    if D_in % 128 != 0:
        cand = _round_up(D_in, 128)
        if (cand - D_in) <= max(1, int(0.15 * D_in)):
            D_in_p = cand

    w1c = jnp.pad(w1c, ((0, D_in_p - D_in), (0, H2p - H2)))
    b1c = jnp.pad(b1c, (0, H2p - H2))
    w2c = jnp.pad(w2c, ((0, H2p - H2), (0, D_out_p - D_out)))
    b2c = jnp.pad(b2c, (0, D_out_p - D_out))

    # Matmul operands in compute dtype; biases stay f32.
    w1c = w1c.astype(mm_dtype)
    w2c = w2c.astype(mm_dtype)
    b1c = b1c.reshape(1, H2p).astype(jnp.float32)
    b2c = b2c.reshape(1, D_out_p).astype(jnp.float32)
    x_mm = x.astype(mm_dtype)
    if D_in_p != D_in:
        x_mm = jnp.pad(x_mm, ((0, 0), (0, D_in_p - D_in)))

    # ---- batch tile: big, multiple of 8, capped by batch size and VMEM ----
    mm_bytes = mm_dtype.itemsize
    out_bytes = out_dtype.itemsize
    # Resident params are SINGLE-buffered (pl.Buffered(1) below).
    param_bytes = (w1c.size + w2c.size) * mm_bytes + (b1c.size + b2c.size) * 4
    # Per batch-row VMEM: double-buffered x tile + double-buffered out tile
    # + f32 hidden activation (chunk cols) + f32 output accumulator.
    per_row = (2 * D_in_p * mm_bytes
               + 2 * D_out_p * out_bytes
               + chunk * 4
               + D_out_p * 4)
    avail = vmem_budget_bytes - param_bytes - (2 << 20)   # 2 MiB compiler slack
    bt_cap = max(8, (max(avail, 0) // per_row) // 8 * 8)

    bt = max(8, min(_round_up(int(batch_tile), 8), _round_up(B, 8)))
    bt = min(bt, bt_cap)

    # Rebalance so batch padding is < 8 rows per tile (no ~2x wasted work when
    # B is just above a tile boundary).
    n_tiles = _cdiv(B, bt)
    bt = max(8, _round_up(_cdiv(B, n_tiles), 8))
    # v7x: two TensorCores per chip -> need >= 2 grid steps to use both.
    if gen >= 7 and n_tiles == 1 and B > 8:
        n_tiles = 2
        bt = max(8, _round_up(_cdiv(B, 2), 8))
    n_tiles = _cdiv(B, bt)
    B_pad = n_tiles * bt
    if B_pad != B:
        x_mm = jnp.pad(x_mm, ((0, B_pad - B), (0, 0)))
    grid = (n_tiles,)

    def const_spec(arr):
        # Full-array block, same block every grid step -> resident in VMEM.
        # Single-buffered: re-fetching never happens, so double-buffering
        # would only burn VMEM.
        return pl.BlockSpec(arr.shape, lambda i: (0, 0),
                            pipeline_mode=pl.Buffered(1))

    vmem_limit = int(min(max(vmem_budget_bytes + (2 << 20), 32 << 20), phys_vmem))

    flops = 2 * B_pad * (D_in_p * H2p + H2p * D_out_p)
    bytes_accessed = (B_pad * D_in_p * mm_bytes
                      + param_bytes
                      + B_pad * D_out_p * out_bytes)

    out = pl.pallas_call(
        _make_kernel(n_chunks, chunk),
        out_shape=jax.ShapeDtypeStruct((B_pad, D_out_p), out_dtype),
        grid_spec=pltpu.PrefetchScalarGridSpec(
            num_scalar_prefetch=0,
            grid=grid,
            in_specs=[
                pl.BlockSpec((bt, D_in_p), lambda i: (i, 0)),
                const_spec(w1c), const_spec(b1c),
                const_spec(w2c), const_spec(b2c),
            ],
            out_specs=pl.BlockSpec((bt, D_out_p), lambda i: (i, 0)),
        ),
        compiler_params=pltpu.CompilerParams(
            dimension_semantics=("parallel",),
            vmem_limit_bytes=vmem_limit,
        ),
        cost_estimate=pl.CostEstimate(
            flops=flops, transcendentals=0, bytes_accessed=bytes_accessed),
    )(x_mm, w1c, b1c, w2c, b2c)

    # Slice off batch padding and lane padding.
    return out[:B, :D_out]


def _make_params(key, d_in, hidden, d_out):
    k1, k2, k3, k4 = jax.random.split(key, 4)
    return {
        "w1": jax.random.normal(k1, (hidden, d_in), jnp.float32) * 0.1,  # [out, in]
        "b1": jax.random.normal(k2, (hidden,), jnp.float32) * 0.1,
        "w2": jax.random.normal(k3, (d_out, hidden), jnp.float32) * 0.1,
        "b2": jax.random.normal(k4, (d_out,), jnp.float32) * 0.1,
    }


def _reference(x, params_a, params_b, alpha):
    def mlp(p):
        h = jnp.maximum(x @ p["w1"].T + p["b1"], 0.0)
        return h @ p["w2"].T + p["b2"]
    return (1.0 - alpha) * mlp(params_a) + alpha * mlp(params_b)


if __name__ == "__main__":
    key = jax.random.PRNGKey(0)
    kx, ka, kb, kx2 = jax.random.split(key, 4)
    alpha = 0.5

    # --- small case: f32-exact path and auto (bf16) path ---
    B, D_in, H, D_out = 16, 32, 64, 32
    x = jax.random.normal(kx, (B, D_in), jnp.float32)
    params_a = _make_params(ka, D_in, H, D_out)
    params_b = _make_params(kb, D_in, H, D_out)
    ref = _reference(x, params_a, params_b, alpha)

    out_f32 = jax.block_until_ready(
        ensemble_forward(x, params_a, params_b, alpha, compute_dtype=jnp.float32))
    assert out_f32.shape == (B, D_out)
    assert jnp.allclose(out_f32, ref, atol=2e-4, rtol=2e-4)

    out_auto = jax.block_until_ready(
        ensemble_forward(x, params_a, params_b, alpha))   # auto: bf16 operands
    assert out_auto.shape == (B, D_out)
    assert jnp.allclose(out_auto, ref, atol=5e-2, rtol=5e-2)

    # --- exercise the hidden-dim chunked reduction + non-multiple batch ---
    B2, H2 = 20, 192                      # fused hidden 384 -> 3 chunks of 128
    x2 = jax.random.normal(kx2, (B2, D_in), jnp.float32)
    pa2 = _make_params(ka, D_in, H2, D_out)
    pb2 = _make_params(kb, D_in, H2, D_out)
    ref2 = _reference(x2, pa2, pb2, alpha)
    out2 = jax.block_until_ready(
        ensemble_forward(x2, pa2, pb2, alpha, compute_dtype=jnp.float32,
                         hidden_chunk=128))
    assert out2.shape == (B2, D_out)
    assert jnp.allclose(out2, ref2, atol=2e-4, rtol=2e-4)

    print("KERNEL_OK")
</pallas_src>

<mosaic_0001>
module attributes {stable_mosaic.version = 11 : i64} {
  func.func @kernel(%arg0: i32, %arg1: memref<16x32xf32, #tpu.memory_space<vmem>>, %arg2: memref<32x128xf32, #tpu.memory_space<vmem>>, %arg3: memref<1x128xf32, #tpu.memory_space<vmem>>, %arg4: memref<128x128xf32, #tpu.memory_space<vmem>>, %arg5: memref<1x128xf32, #tpu.memory_space<vmem>>, %arg6: memref<16x128xf32, #tpu.memory_space<vmem>>) attributes {dimension_semantics = [#tpu.dimension_semantics<parallel>], iteration_bounds = array<i64: 1>, scalar_prefetch = 0 : i64, scratch_operands = 0 : i64, tpu.core_type = #tpu.core_type<tc>, window_params = [{transform_indices = @transform_0, window_bounds = array<i64: 16, 32>}, {pipeline_mode = #tpu.pipeline_mode<synchronous>, transform_indices = @transform_1, window_bounds = array<i64: 32, 128>}, {pipeline_mode = #tpu.pipeline_mode<synchronous>, transform_indices = @transform_2, window_bounds = array<i64: 1, 128>}, {pipeline_mode = #tpu.pipeline_mode<synchronous>, transform_indices = @transform_3, window_bounds = array<i64: 128, 128>}, {pipeline_mode = #tpu.pipeline_mode<synchronous>, transform_indices = @transform_4, window_bounds = array<i64: 1, 128>}, {transform_indices = @transform_5, window_bounds = array<i64: 16, 128>}]} {
    %c0 = arith.constant 0 : index
    %c0_0 = arith.constant 0 : index
    %0 = vector.load %arg1[%c0, %c0_0] : memref<16x32xf32, #tpu.memory_space<vmem>>, vector<16x32xf32>
    %c0_1 = arith.constant 0 : index
    %c0_2 = arith.constant 0 : index
    %1 = vector.load %arg2[%c0_1, %c0_2] : memref<32x128xf32, #tpu.memory_space<vmem>>, vector<32x128xf32>
    %cst = arith.constant dense<0.000000e+00> : vector<16x128xf32>
    %2 = tpu.matmul %0, %1, %cst {dimension_numbers = #tpu.dot_dimension_numbers<[1], [0], [0], [1], [0, 0, 1, 1], [], []>} : vector<16x32xf32>, vector<32x128xf32>, vector<16x128xf32> -> vector<16x128xf32>
    %c0_3 = arith.constant 0 : index
    %c0_4 = arith.constant 0 : index
    %3 = vector.load %arg3[%c0_3, %c0_4] : memref<1x128xf32, #tpu.memory_space<vmem>>, vector<1x128xf32>
    %4 = vector.broadcast %3 : vector<1x128xf32> to vector<16x128xf32>
    %5 = arith.addf %2, %4 : vector<16x128xf32>
    %cst_5 = arith.constant 0.000000e+00 : f32
    %6 = vector.broadcast %cst_5 : f32 to vector<16x128xf32>
    %7 = arith.maximumf %5, %6 : vector<16x128xf32>
    %c0_6 = arith.constant 0 : index
    %c0_7 = arith.constant 0 : index
    %8 = vector.load %arg4[%c0_6, %c0_7] : memref<128x128xf32, #tpu.memory_space<vmem>>, vector<128x128xf32>
    %cst_8 = arith.constant dense<0.000000e+00> : vector<16x128xf32>
    %9 = tpu.matmul %7, %8, %cst_8 {dimension_numbers = #tpu.dot_dimension_numbers<[1], [0], [0], [1], [0, 0, 1, 1], [], []>} : vector<16x128xf32>, vector<128x128xf32>, vector<16x128xf32> -> vector<16x128xf32>
    %c0_9 = arith.constant 0 : index
    %c0_10 = arith.constant 0 : index
    %10 = vector.load %arg5[%c0_9, %c0_10] : memref<1x128xf32, #tpu.memory_space<vmem>>, vector<1x128xf32>
    %11 = vector.broadcast %10 : vector<1x128xf32> to vector<16x128xf32>
    %12 = arith.addf %9, %11 : vector<16x128xf32>
    %c0_11 = arith.constant 0 : index
    %c0_12 = arith.constant 0 : index
    %13 = vector.load %arg6[%c0_11, %c0_12] : memref<16x128xf32, #tpu.memory_space<vmem>>, vector<16x128xf32>
    tpu.vector_store %arg6[%c0_11, %c0_12], %12 {strides = array<i32>} : memref<16x128xf32, #tpu.memory_space<vmem>>, vector<16x128xf32>,
    return
  }
  func.func @transform_0(%arg0: i32) -> (i32, i32) {
    %c0_i32 = arith.constant 0 : i32
    %c0_i32_0 = arith.constant 0 : i32
    return %arg0, %c0_i32 : i32, i32
  }
  func.func @transform_1(%arg0: i32) -> (i32, i32) {
    %c0_i32 = arith.constant 0 : i32
    %c0_i32_0 = arith.constant 0 : i32
    %c0_i32_1 = arith.constant 0 : i32
    return %c0_i32, %c0_i32_0 : i32, i32
  }
  func.func @transform_2(%arg0: i32) -> (i32, i32) {
    %c0_i32 = arith.constant 0 : i32
    %c0_i32_0 = arith.constant 0 : i32
    %c0_i32_1 = arith.constant 0 : i32
    return %c0_i32, %c0_i32_0 : i32, i32
  }
  func.func @transform_3(%arg0: i32) -> (i32, i32) {
    %c0_i32 = arith.constant 0 : i32
    %c0_i32_0 = arith.constant 0 : i32
    %c0_i32_1 = arith.constant 0 : i32
    return %c0_i32, %c0_i32_0 : i32, i32
  }
  func.func @transform_4(%arg0: i32) -> (i32, i32) {
    %c0_i32 = arith.constant 0 : i32
    %c0_i32_0 = arith.constant 0 : i32
    %c0_i32_1 = arith.constant 0 : i32
    return %c0_i32, %c0_i32_0 : i32, i32
  }
  func.func @transform_5(%arg0: i32) -> (i32, i32) {
    %c0_i32 = arith.constant 0 : i32
    %c0_i32_0 = arith.constant 0 : i32
    return %arg0, %c0_i32 : i32, i32
  }
}

</mosaic_0001>

<bundles_post_ra>
// kernel: tpu_custom_call.1
= control target key start
LH: loop header
LB: loop body
LE: loop exit
PB: predicated region body
PF: predicated region fallthrough
CT: control target
= control target key end

     0   :  { %10 = vsyncpa [#allocation3], 0  ;;  %s602_s0 = inlined_call_operand.hbm [shape: f32[16,32], index: 0, kind: input, shape index: {}]   ;;  %s603_s1 = inlined_call_operand.hbm [shape: f32[32,128], index: 1, kind: input, shape index: {}]   ;;  %s604_s2 = inlined_call_operand.vmem [shape: f32[1,128], index: 2, kind: input, shape index: {}]   ;;  %s605_s3 = inlined_call_operand.hbm [shape: f32[128,128], index: 3, kind: input, shape index: {}]   ;;  %s606_s4 = inlined_call_operand.vmem [shape: f32[1,128], index: 4, kind: input, shape index: {}]   ;;  %s607_s5 = inlined_call_operand.hbm [shape: f32[16,128], index: 5, kind: output, shape index: {}]  }
   0x1   :  { %11 = vsyncpa [#allocation6], 0 }
   0x2   :  { %12 = vsyncpa [#allocation4], 0  ;;  %s491_s18 = smov [#allocation5]   ;;  %s492_s20 = smov [#allocation2]  }
   0x3   :  { %s30_s19 = sshll.u32 %s491_s18, 4  ;;  %s18_s21 = sshll.u32 %s492_s20, 4  ;;  %s31_s19 = int_to_ptr.vmem [resolvable:$true] %s30_s19  ;;  %s527_s21 = int_to_ptr.vmem [resolvable:$true] %s18_s21 }
   0x4   :  { %s397_s24 = scalar_lea.hbm %s603_s1, 512 }
   0x5   :  { %p398_p0 = scmp.ne.s32.totalorder %s603_s1, %s397_s24  ;;  %p401_p1 = scmp.lt.u32.totalorder %s397_s24, %s603_s1 }
   0x7   :  { %p403_p2 = pnand %p401_p1, %p398_p0 }
   0x9   :  { %406 = shalt.err (!%p403_p2)
}
   0xa   :  { %s407_s29 = scalar_lea.vmem %s31_s19, 512  ;;  %p412_p4 = scmp.lt.s32.totalorder %s31_s19, %s31_s19 }
   0xb   :  { %p408_p3 = scmp.ne.s32.totalorder %s31_s19, %s407_s29  ;;  %p413_p5 = scmp.lt.s32.totalorder %s407_s29, %s407_s29 }
   0xd   :  { %p414_p6 = por %p413_p5, %p412_p4 }
   0xf   :  { %p415_p7 = pnand %p414_p6, %p408_p3 }
  0x11   :  { %418 = shalt.err (!%p415_p7)
}
  0x12   :  { %s493_s30 = smov 128   ;;  %s494_s6 = smov 8  }
  0x13   :  { %36 = dma.hbm_to_vmem [thread:$0]  %s603_s1, 512, %s31_s19, [#allocation6], %s493_s30, %s493_s30, %s494_s6  }
  0x14   :  { %s419_s11 = scalar_lea.hbm %s602_s0, 256 }
  0x15   :  { %p420_p8 = scmp.ne.s32.totalorder %s602_s0, %s419_s11  ;;  %p423_p9 = scmp.lt.u32.totalorder %s419_s11, %s602_s0 }
  0x17   :  { %p425_p10 = pnand %p423_p9, %p420_p8 }
  0x19   :  { %428 = shalt.err (!%p425_p10)
}
  0x1a   :  { %s429_s16 = scalar_lea.vmem %s527_s21, 256  ;;  %p434_p12 = scmp.lt.s32.totalorder %s527_s21, %s527_s21 }
  0x1b   :  { %p430_p11 = scmp.ne.s32.totalorder %s527_s21, %s429_s16  ;;  %p435_p13 = scmp.lt.s32.totalorder %s429_s16, %s429_s16 }
  0x1d   :  { %p436_p0 = por %p435_p13, %p434_p12 }
  0x1f   :  { %p437_p1 = pnand %p436_p0, %p430_p11 }
  0x21   :  { %440 = shalt.err (!%p437_p1)
}
  0x22   :  { %24 = dma.hbm_to_vmem [thread:$0]  %s602_s0, 256, %s527_s21, [#allocation3], %s493_s30, %s493_s30, %s494_s6  }
  0x23   :  { %s495_s18 = smov [#allocation7]   ;;  %s441_s23 = scalar_lea.hbm %s605_s3, 2048 }
  0x24   :  { %s44_s19 = sshll.u32 %s495_s18, 4  ;;  %p442_p2 = scmp.ne.s32.totalorder %s605_s3, %s441_s23  ;;  %s45_s19 = int_to_ptr.vmem [resolvable:$true] %s44_s19 }
  0x25   :  { %p445_p3 = scmp.lt.u32.totalorder %s441_s23, %s605_s3 }
  0x27   :  { %p447_p4 = pnand %p445_p3, %p442_p2 }
  0x29   :  { %450 = shalt.err (!%p447_p4)
}
  0x2a   :  { %s451_s28 = scalar_lea.vmem %s45_s19, 2048  ;;  %p456_p6 = scmp.lt.s32.totalorder %s45_s19, %s45_s19 }
  0x2b   :  { %p452_p5 = scmp.ne.s32.totalorder %s45_s19, %s451_s28  ;;  %p457_p7 = scmp.lt.s32.totalorder %s451_s28, %s451_s28 }
  0x2d   :  { %p458_p8 = por %p457_p7, %p456_p6 }
  0x2f   :  { %p459_p9 = pnand %p458_p8, %p452_p5 }
  0x31   :  { %462 = shalt.err (!%p459_p9)
}
  0x32   :  { %50 = dma.hbm_to_vmem [thread:$0]  %s605_s3, 2048, %s45_s19, [#allocation6], %s493_s30, %s493_s30, %s494_s6  }
  0x33   :  { %485 = dma.done.wait [#allocation3], 256  }
  0x34   :  { %486 = vsyncadd [#allocation3], 4294967040 }
  0x35   :  { %487 = dma.done.wait [#allocation6], 2560  }
  0x36   :  { %488 = vsyncadd [#allocation6], 4294964736  ;;  %vm75_vm0 = vcmask 261120   ;;  %v64_v0 = vld [vmem:[#allocation5] sm:$0xff]  ;;  %v65_v1 = vld [vmem:[#allocation5 + $0x8] sm:$0xff]  ;;  %s496_s9 = smov [#allocation8]  }
  0x37   :  { %v66_v2 = vld [vmem:[#allocation5 + $0x10] sm:$0xff]  ;;  %v351_v3 = vpack.c.bf16 %v65_v1, %v64_v0  ;;  %v67_v4 = vld [vmem:[#allocation5 + $0x18] sm:$0xff]  ;;  %v159_v7 = vld [vmem:[#allocation7] sm:$0xff]  ;;  %s264_s10 = sshll.u32 %s496_s9, 4  ;;  %s265_s10 = int_to_ptr.vmem [resolvable:$true] %s264_s10 }
  0x38   :  { %v62_v5 = vld [vmem:[#allocation2] sm:$0xff]  ;;  %v355_v6 = vpack.c.bf16 %v67_v4, %v66_v2  ;;  %v160_v8 = vld [vmem:[#allocation7 + $0x8] sm:$0xff]  ;;  %v162_v11 = vld [vmem:[#allocation7 + $0x18] sm:$0xff]  ;;  %p468_p11 = scmp.lt.s32.totalorder %s265_s10, %s265_s10 }
  0x39   :  { %313 = vmatprep.mubr.msk.f32.mxu0 %vm75_vm0, %v62_v5  ;;  %v161_v9 = vld [vmem:[#allocation7 + $0x10] sm:$0xff]  ;;  %352 = vmatprep.subr.bf16.mxu0 %v351_v3  ;;  %v359_v10 = vpack.c.bf16 %v160_v8, %v159_v7  ;;  %v163_v13 = vld [vmem:[#allocation7 + $0x20] sm:$0xff]  ;;  %v164_v14 = vld [vmem:[#allocation7 + $0x28] sm:$0xff] }
  0x3a   :  { %354 = vmatpush3.bf16.msra.mxu0 %v351_v3  ;;  %v363_v12 = vpack.c.bf16 %v162_v11, %v161_v9  ;;  %v367_v15 = vpack.c.bf16 %v164_v14, %v163_v13  ;;  %v63_v16 = vld [vmem:[#allocation2 + $0x8] sm:$0xff]  ;;  %v165_v17 = vld [vmem:[#allocation7 + $0x30] sm:$0xff]  ;;  %v167_v20 = vld [vmem:[#allocation7 + $0x40] sm:$0xff] }
  0x3b   :  { %356 = vmatprep.subr.bf16.mxu0 %v355_v6  ;;  %360 = vmatprep.subr.bf16.mxu1 %v359_v10  ;;  %v166_v18 = vld [vmem:[#allocation7 + $0x38] sm:$0xff]  ;;  %v168_v21 = vld [vmem:[#allocation7 + $0x48] sm:$0xff]  ;;  %v169_v23 = vld [vmem:[#allocation7 + $0x50] sm:$0xff] }
  0x3c   :  { %362 = vmatpush3.bf16.msra.mxu1 %v359_v10  ;;  %v371_v19 = vpack.c.bf16 %v166_v18, %v165_v17  ;;  %v375_v22 = vpack.c.bf16 %v168_v21, %v167_v20  ;;  %v170_v24 = vld [vmem:[#allocation7 + $0x58] sm:$0xff]  ;;  %v171_v26 = vld [vmem:[#allocation7 + $0x60] sm:$0xff]  ;;  %v172_v27 = vld [vmem:[#allocation7 + $0x68] sm:$0xff] }
  0x3d   :  { %364 = vmatprep.subr.bf16.mxu1 %v363_v12  ;;  %v379_v25 = vpack.c.bf16 %v170_v24, %v169_v23  ;;  %v383_v28 = vpack.c.bf16 %v172_v27, %v171_v26  ;;  %v173_v29 = vld [vmem:[#allocation7 + $0x70] sm:$0xff]  ;;  %v174_v30 = vld [vmem:[#allocation7 + $0x78] sm:$0xff] }
  0x3e   :  { %358 = vmatpush3.bf16.msra.mxu0 %v355_v6  ;;  %v387_v31 = vpack.c.bf16 %v174_v30, %v173_v29  ;;  %v277_v32 = vld [vmem:[%s604_s2] ss:$0 sm:$0xff]  ;;  %s463_s2 = scalar_lea.vmem %s265_s10, 256 }
  0x3f   :  { %v280_v39 = vld [vmem:[%s606_s4] ss:$0 sm:$0xff]  ;;  %p464_p10 = scmp.ne.s32.totalorder %s265_s10, %s463_s2  ;;  %p469_p12 = scmp.lt.s32.totalorder %s463_s2, %s463_s2 }
  0x40   :  { %366 = vmatpush3.bf16.msra.mxu1 %v363_v12 }
  0x41   :  { %314 = vmatmul.mubr.msk.f32.vlgmr.msra.gmra.mrb[0].mxu0 %vm75_vm0, %v63_v16  ;;  %368 = vmatprep.subr.bf16.mxu1 %v367_v15  ;;  %p470_p13 = por %p469_p12, %p468_p11 }
  0x43   :  { %p471_p0 = pnand %p470_p13, %p464_p10 }
  0x44   :  { %370 = vmatpush3.bf16.msra.mxu1 %v367_v15 }
  0x45   :  { %372 = vmatprep.subr.bf16.mxu1 %v371_v19 }
  0x48   :  { %374 = vmatpush3.bf16.msra.mxu1 %v371_v19 }
  0x49   :  { %376 = vmatprep.subr.bf16.mxu1 %v375_v22 }
  0x4c   :  { %378 = vmatpush3.bf16.msra.mxu1 %v375_v22 }
  0x4d   :  { %380 = vmatprep.subr.bf16.mxu1 %v379_v25 }
  0x50   :  { %382 = vmatpush3.bf16.msra.mxu1 %v379_v25 }
  0x51   :  { %384 = vmatprep.subr.bf16.mxu1 %v383_v28 }
  0x54   :  { %386 = vmatpush3.bf16.msra.mxu1 %v383_v28 }
  0x55   :  { %388 = vmatprep.subr.bf16.mxu1 %v387_v31 }
  0x58   :  { %390 = vmatpush3.bf16.msra.mxu1 %v387_v31 }
 0x114   :  { %v315_v33 = vpop.f32.mrb[0].mxu0 }
 0x115   :  { %v154_v34 = vadd.f32 %v315_v33, %v277_v32  ;;  %v148_v35 = vpop.f32.mrb[1].mxu0 }
 0x116   :  { %v149_v36 = vadd.f32 %v277_v32, %v148_v35 }
 0x117   :  { %v158_v38 = vmax.f32 %v154_v34, 0.0 }
 0x118   :  { %v157_v37 = vmax.f32 %v149_v36, 0.0 }
 0x11a   :  { %348 = vmatprep.mubr.f32.mxu1 %v157_v37 }
 0x11b   :  { %349 = vmatmul.mubr.f32.vlgmr.msra.gmra.mrb[0].mxu1 %v158_v38 }
 0x1ee   :  { %v350_v40 = vpop.f32.mrb[0].mxu1 }
 0x1ef   :  { %v254_v41 = vadd.f32 %v350_v40, %v280_v39  ;;  %v248_v42 = vpop.f32.mrb[1].mxu1 }
 0x1f0   :  { %v249_v43 = vadd.f32 %v280_v39, %v248_v42 }
 0x1f1   :  { %258 = vst [vmem:[#allocation8 + $0x8] sm:$0xff] %v254_v41 }
 0x1f2   :  { %257 = vst [vmem:[#allocation8] sm:$0xff] %v249_v43 }
 0x1f3   :  { %474 = shalt.err (!%p471_p0)
}
 0x1f4   :  { %s475_s4 = scalar_lea.hbm %s607_s5, 256 }
 0x1f5   :  { %p476_p1 = scmp.ne.s32.totalorder %s607_s5, %s475_s4  ;;  %p479_p2 = scmp.lt.u32.totalorder %s475_s4, %s607_s5 }
 0x1f7   :  { %p481_p3 = pnand %p479_p2, %p476_p1 }
 0x1f9   :  { %484 = shalt.err (!%p481_p3)
}
 0x1fa   :  { %270 = dma.vmem_to_hbm [thread:$0]  %s265_s10, 256, %s607_s5, [#allocation4], %s493_s30, %s493_s30, %s494_s6  }
 0x1fb   :  { %489 = dma.done.wait [#allocation4], 256  }
 0x1fc   :  { %490 = vsyncadd [#allocation4], 4294967040 }
 0x1fd   :  { %274 = vsyncpa [#allocation3], 1 }
 0x1fe   :  { %275 = vsyncpa [#allocation6], 1 }
 0x1ff   :  { %276 = vsyncpa [#allocation4], 1 }

</bundles_post_ra>
